<compile_context>
chip_gen: v7x
topology: tpu7x:2x2x1
jax: 0.10.0
libtpu: 0.0.40
codegen_flags: <defaults>
</compile_context>

<pallas_src>
import functools

import jax
import jax.numpy as jnp
from jax import lax
from jax.experimental import pallas as pl
from jax.experimental.pallas import tpu as pltpu


def _eee_head_kernel(x_ref, w1_ref, b1_ref, w2_ref, b2_ref, o_ref, acc_ref,
                     *, lane_groups, rem_last, mask_tail, wide_acc):
    # x_ref:  (Nt, C, St) input tile (native dtype)
    # w1_ref: (C, C)  FC1 weight, pre-scaled by 1/S (f32)
    # b1_ref: (1, C)  FC1 bias
    # w2_ref: (1, C)  FC2 weight as a row
    # b2_ref: (1, 1)  FC2 bias
    # o_ref:  (Nt, 1) output block (f32)
    # acc_ref: VMEM running sum over S: (Nt, C, 128) if wide_acc else (Nt, C)
    s = pl.program_id(1)
    last_s = pl.num_programs(1) - 1

    @pl.when(s == 0)
    def _init():
        acc_ref[...] = jnp.zeros_like(acc_ref)

    xt = x_ref[...].astype(jnp.float32)  # (Nt, C, St)

    def accumulate(xv):
        if wide_acc:
            # Pure VPU adds of 128-lane groups; the cross-lane reduce is
            # deferred to the epilogue.  Lane slices at multiples of 128 are
            # whole vregs (no data movement).
            acc = acc_ref[...]
            for g in range(lane_groups):
                acc = acc + xv[:, :, g * 128:(g + 1) * 128]
            acc_ref[...] = acc
        else:
            acc_ref[...] += jnp.sum(xv, axis=-1)

    if mask_tail:
        # Only the last S block overhangs the array; mask its invalid lanes
        # with `where` (not multiply) so OOB garbage (possibly NaN) can't leak.
        @pl.when(s == last_s)
        def _tail():
            lane = lax.broadcasted_iota(jnp.int32, xt.shape, dimension=2)
            accumulate(jnp.where(lane < rem_last, xt, 0.0))

        @pl.when(s != last_s)
        def _body():
            accumulate(xt)
    else:
        accumulate(xt)

    @pl.when(s == last_s)
    def _epilogue():
        if wide_acc:
            pooled = jnp.sum(acc_ref[...], axis=-1)          # (Nt, C), one XLU reduce
        else:
            pooled = acc_ref[...]                             # (Nt, C)
        # FC1 (+ folded 1/S) -> tanh.  Kept in f32 (safe on v5e).
        h = jnp.tanh(
            jnp.dot(pooled, w1_ref[...], preferred_element_type=jnp.float32)
            + b1_ref[...]
        )                                                     # (Nt, C)
        # FC2 as VPU mul + lane reduce (avoids a 1-lane MXU matmul).
        y = jnp.sum(h * w2_ref[...], axis=-1, keepdims=True) + b2_ref[...]
        o_ref[...] = jnp.maximum(y, 0.0).astype(o_ref.dtype)  # eval-mode ReLU


def _round_up(a, b):
    return -(-a // b) * b


def energy_estimate_head_forward(x, w1, b1, w2, b2,
                                 *, vmem_budget_bytes=24 * 1024 * 1024):
    """EnergyEstimateHead forward (mode='3D', eval).

    x : (N, C, T, H, W), f32 or bf16 (streamed in native dtype)
    w1: (C, C)  first Linear weight, (in, out) convention
    b1: (C,)
    w2: (C, 1)  second Linear weight, (in, out) convention
    b2: (1,)
    Returns (N, 1) float32.
    """
    N, C, T, H, W = x.shape
    S = T * H * W
    itemsize = jnp.dtype(x.dtype).itemsize

    # ---- Tile sizing (dtype-aware, VMEM-budgeted) ---------------------------
    s_full = _round_up(S, 128)

    # Fixed resident VMEM: double-buffered (C, C) w1 + small operands + slack.
    fixed_bytes = 2 * C * C * 4 + 8 * C * 4 + 4096

    # Start with the minimal N tile, maximize the contiguous S tile.
    nt = N if N <= 8 else 8
    avail = vmem_budget_bytes - fixed_bytes - nt * C * 4
    if avail > 0:
        s_tile = (avail // (2 * nt * C * itemsize)) // 128 * 128
    else:
        s_tile = 0
    s_tile = max(128, min(s_tile, 16384))
    s_tile = min(s_tile, s_full)

    # If the whole S fits in one tile, grow the N tile to fill the budget.
    if s_tile == s_full and N > nt:
        per_row = 2 * C * s_tile * itemsize + C * 4
        nt_budget = int((vmem_budget_bytes - fixed_bytes) // per_row)
        nt_budget = max(nt, (nt_budget // 8) * 8)
        nt = min(nt_budget, _round_up(N, 8), 256)

    # Keep >= 2 N blocks when N >= 16 so dual-TC parts (v7x) get parallel work
    # on the "parallel" N axis (negligible cost on single-TC parts).
    if N >= 16:
        nt = min(nt, _round_up(-(-N // 2), 8))
    nt = max(nt, 1)

    n_blocks = -(-N // nt)
    n_pad = n_blocks * nt
    s_blocks = -(-S // s_tile)
    rem_last = S - (s_blocks - 1) * s_tile
    mask_tail = (S % s_tile) != 0
    lane_groups = s_tile // 128

    # Lane-wide accumulator only when it stays small (<= ~1 MiB).
    wide_acc = (nt * C) <= 2048
    acc_shape = (nt, C, 128) if wide_acc else (nt, C)
    acc_bytes = nt * C * (128 if wide_acc else 1) * 4

    # Derive the compiler VMEM limit from the actual footprint (+ headroom).
    footprint = (2 * nt * C * s_tile * itemsize   # x double buffer
                 + acc_bytes                      # accumulator scratch
                 + fixed_bytes                    # w1 (x2) + biases + slack
                 + 2 * nt * 4)                    # output double buffer
    vmem_limit = max(footprint + 2 * 1024 * 1024, 16 * 1024 * 1024)

    # ---- Glue reshapes (no HBM pad copy) ------------------------------------
    x3 = x.reshape(N, C, S)                               # contiguous merge, free
    w1_scaled = (w1.astype(jnp.float32) / jnp.float32(S))  # fold avg-pool's 1/S
    b1_2d = b1.reshape(1, C).astype(jnp.float32)
    w2_row = w2.reshape(1, C).astype(jnp.float32)
    b2_2d = b2.reshape(1, 1).astype(jnp.float32)

    grid = (n_blocks, s_blocks)

    cost = pl.CostEstimate(
        flops=2 * N * C * S + 2 * N * C * C + 2 * N * C,
        transcendentals=N * C,
        bytes_accessed=N * C * S * itemsize + (C * C + 3 * C + 1) * 4 + N * 4,
    )

    kernel = functools.partial(
        _eee_head_kernel,
        lane_groups=lane_groups,
        rem_last=rem_last,
        mask_tail=mask_tail,
        wide_acc=wide_acc,
    )

    # TODO(synk): for N >> 1e4, reshape the output to a lane-dense (N/128, 128)
    # slab to avoid per-block masked 4-byte writebacks (negligible here).
    out = pl.pallas_call(
        kernel,
        out_shape=jax.ShapeDtypeStruct((n_pad, 1), jnp.float32),
        grid_spec=pltpu.PrefetchScalarGridSpec(
            num_scalar_prefetch=0,
            grid=grid,
            in_specs=[
                pl.BlockSpec((nt, C, s_tile), lambda n, s: (n, 0, s)),
                pl.BlockSpec((C, C), lambda n, s: (0, 0)),
                pl.BlockSpec((1, C), lambda n, s: (0, 0)),
                pl.BlockSpec((1, C), lambda n, s: (0, 0)),
                pl.BlockSpec((1, 1), lambda n, s: (0, 0)),
            ],
            out_specs=pl.BlockSpec((nt, 1), lambda n, s: (n, 0)),
            scratch_shapes=[pltpu.VMEM(acc_shape, jnp.float32)],
        ),
        compiler_params=pltpu.CompilerParams(
            dimension_semantics=("parallel", "arbitrary"),
            vmem_limit_bytes=int(vmem_limit),
        ),
        cost_estimate=cost,
    )(x3, w1_scaled, b1_2d, w2_row, b2_2d)

    return out[:N]


def _reference_forward(x, w1, b1, w2, b2):
    pooled = jnp.mean(x.astype(jnp.float32), axis=(2, 3, 4))
    h = jnp.tanh(pooled @ w1 + b1)
    y = h @ w2 + b2
    return jnp.maximum(y, 0.0)


if __name__ == "__main__":
    init_std = 0.01
    key = jax.random.PRNGKey(0)

    def make_params(k, C):
        kw1, kb1, kw2, kb2 = jax.random.split(k, 4)
        w1 = init_std * jax.random.normal(kw1, (C, C), dtype=jnp.float32)
        b1 = init_std * jax.random.normal(kb1, (C,), dtype=jnp.float32)
        w2 = init_std * jax.random.normal(kw2, (C, 1), dtype=jnp.float32)
        b2 = init_std * jax.random.normal(kb2, (1,), dtype=jnp.float32)
        return w1, b1, w2, b2

    kx1, kx2, kx3, kp = jax.random.split(key, 4)

    # Case 1: module-like small shape; tiny budget forces a multi-step S grid.
    N, C, T, H, W = 2, 32, 4, 8, 8
    w1, b1, w2, b2 = make_params(kp, C)
    x = jax.random.normal(kx1, (N, C, T, H, W), dtype=jnp.float32)
    out = jax.block_until_ready(
        energy_estimate_head_forward(x, w1, b1, w2, b2,
                                     vmem_budget_bytes=64 * 1024))
    ref = _reference_forward(x, w1, b1, w2, b2)
    assert out.shape == (N, 1), out.shape
    assert jnp.allclose(out, ref, atol=1e-5, rtol=1e-5), (out, ref)

    # Case 2: ragged S (S = 75, not a multiple of 128) -> in-kernel tail mask.
    N2, T2, H2, W2 = 3, 3, 5, 5
    x2 = jax.random.normal(kx2, (N2, C, T2, H2, W2), dtype=jnp.float32)
    out2 = jax.block_until_ready(
        energy_estimate_head_forward(x2, w1, b1, w2, b2))
    ref2 = _reference_forward(x2, w1, b1, w2, b2)
    assert out2.shape == (N2, 1), out2.shape
    assert jnp.allclose(out2, ref2, atol=1e-5, rtol=1e-5), (out2, ref2)

    # Case 3: larger ragged N (20) -> grown N tile, 2 N blocks, overhanging
    # last N block sliced off in the wrapper.
    N3 = 20
    x3_in = jax.random.normal(kx3, (N3, C, T, H, W), dtype=jnp.float32)
    out3 = jax.block_until_ready(
        energy_estimate_head_forward(x3_in, w1, b1, w2, b2))
    ref3 = _reference_forward(x3_in, w1, b1, w2, b2)
    assert out3.shape == (N3, 1), out3.shape
    assert jnp.allclose(out3, ref3, atol=1e-5, rtol=1e-5), (out3, ref3)

    print("KERNEL_OK")
</pallas_src>

<mosaic_0001>
module attributes {stable_mosaic.version = 11 : i64} {
  func.func @_eee_head_kernel(%arg0: i32, %arg1: i32, %arg2: memref<2x32x128xf32, #tpu.memory_space<vmem>>, %arg3: memref<32x32xf32, #tpu.memory_space<vmem>>, %arg4: memref<1x32xf32, #tpu.memory_space<vmem>>, %arg5: memref<1x32xf32, #tpu.memory_space<vmem>>, %arg6: memref<1x1xf32, #tpu.memory_space<vmem>>, %arg7: memref<2x1xf32, #tpu.memory_space<vmem>>, %arg8: memref<2x32x128xf32, #tpu.memory_space<vmem>>) attributes {dimension_semantics = [#tpu.dimension_semantics<parallel>, #tpu.dimension_semantics<arbitrary>], iteration_bounds = array<i64: 1, 2>, scalar_prefetch = 0 : i64, scratch_operands = 1 : i64, tpu.core_type = #tpu.core_type<tc>, window_params = [{transform_indices = @transform_0, window_bounds = array<i64: 2, 32, 128>}, {pipeline_mode = #tpu.pipeline_mode<synchronous>, transform_indices = @transform_1, window_bounds = array<i64: 32, 32>}, {pipeline_mode = #tpu.pipeline_mode<synchronous>, transform_indices = @transform_2, window_bounds = array<i64: 1, 32>}, {pipeline_mode = #tpu.pipeline_mode<synchronous>, transform_indices = @transform_3, window_bounds = array<i64: 1, 32>}, {pipeline_mode = #tpu.pipeline_mode<synchronous>, transform_indices = @transform_4, window_bounds = array<i64: 1, 1>}, {transform_indices = @transform_5, window_bounds = array<i64: 2, 1>}]} {
    %c0_i32 = arith.constant 0 : i32
    %0 = arith.cmpi eq, %arg1, %c0_i32 : i32
    %1 = arith.extui %0 : i1 to i32
    %c0_i32_0 = arith.constant 0 : i32
    %2 = arith.cmpi ne, %1, %c0_i32_0 : i32
    scf.if %2 {
      %cst = arith.constant 0.000000e+00 : f32
      %10 = vector.broadcast %cst : f32 to vector<2x32x128xf32>
      %c0_10 = arith.constant 0 : index
      %c0_11 = arith.constant 0 : index
      %c0_12 = arith.constant 0 : index
      %11 = vector.load %arg8[%c0_10, %c0_11, %c0_12] : memref<2x32x128xf32, #tpu.memory_space<vmem>>, vector<2x32x128xf32>
      tpu.vector_store %arg8[%c0_10, %c0_11, %c0_12], %10 {strides = array<i32>} : memref<2x32x128xf32, #tpu.memory_space<vmem>>, vector<2x32x128xf32>,
    } else {
    }
    %c0 = arith.constant 0 : index
    %c0_1 = arith.constant 0 : index
    %c0_2 = arith.constant 0 : index
    %3 = vector.load %arg2[%c0, %c0_1, %c0_2] : memref<2x32x128xf32, #tpu.memory_space<vmem>>, vector<2x32x128xf32>
    %c0_3 = arith.constant 0 : index
    %c0_4 = arith.constant 0 : index
    %c0_5 = arith.constant 0 : index
    %4 = vector.load %arg8[%c0_3, %c0_4, %c0_5] : memref<2x32x128xf32, #tpu.memory_space<vmem>>, vector<2x32x128xf32>
    %5 = arith.addf %4, %3 : vector<2x32x128xf32>
    %c0_6 = arith.constant 0 : index
    %c0_7 = arith.constant 0 : index
    %c0_8 = arith.constant 0 : index
    %6 = vector.load %arg8[%c0_6, %c0_7, %c0_8] : memref<2x32x128xf32, #tpu.memory_space<vmem>>, vector<2x32x128xf32>
    tpu.vector_store %arg8[%c0_6, %c0_7, %c0_8], %5 {strides = array<i32>} : memref<2x32x128xf32, #tpu.memory_space<vmem>>, vector<2x32x128xf32>,
    %c1_i32 = arith.constant 1 : i32
    %7 = arith.cmpi eq, %arg1, %c1_i32 : i32
    %8 = arith.extui %7 : i1 to i32
    %c0_i32_9 = arith.constant 0 : i32
    %9 = arith.cmpi ne, %8, %c0_i32_9 : i32
    scf.if %9 {
      %c0_10 = arith.constant 0 : index
      %c0_11 = arith.constant 0 : index
      %c0_12 = arith.constant 0 : index
      %10 = vector.load %arg8[%c0_10, %c0_11, %c0_12] : memref<2x32x128xf32, #tpu.memory_space<vmem>>, vector<2x32x128xf32>
      %cst = arith.constant dense<0.000000e+00> : vector<2x32xf32>
      %11 = vector.multi_reduction <add>, %10, %cst [2] : vector<2x32x128xf32> to vector<2x32xf32>
      %c0_13 = arith.constant 0 : index
      %c0_14 = arith.constant 0 : index
      %12 = vector.load %arg3[%c0_13, %c0_14] : memref<32x32xf32, #tpu.memory_space<vmem>>, vector<32x32xf32>
      %cst_15 = arith.constant dense<0.000000e+00> : vector<2x32xf32>
      %13 = tpu.matmul %11, %12, %cst_15 {dimension_numbers = #tpu.dot_dimension_numbers<[1], [0], [0], [1], [0, 0, 1, 1], [], []>} : vector<2x32xf32>, vector<32x32xf32>, vector<2x32xf32> -> vector<2x32xf32>
      %c0_16 = arith.constant 0 : index
      %c0_17 = arith.constant 0 : index
      %14 = vector.load %arg4[%c0_16, %c0_17] : memref<1x32xf32, #tpu.memory_space<vmem>>, vector<1x32xf32>
      %15 = vector.broadcast %14 : vector<1x32xf32> to vector<2x32xf32>
      %16 = arith.addf %13, %15 : vector<2x32xf32>
      %17 = math.tanh %16 : vector<2x32xf32>
      %c0_18 = arith.constant 0 : index
      %c0_19 = arith.constant 0 : index
      %18 = vector.load %arg5[%c0_18, %c0_19] : memref<1x32xf32, #tpu.memory_space<vmem>>, vector<1x32xf32>
      %19 = vector.broadcast %18 : vector<1x32xf32> to vector<2x32xf32>
      %20 = arith.mulf %17, %19 : vector<2x32xf32>
      %cst_20 = arith.constant dense<0.000000e+00> : vector<2xf32>
      %21 = vector.multi_reduction <add>, %20, %cst_20 [1] : vector<2x32xf32> to vector<2xf32>
      %22 = vector.shape_cast %21 : vector<2xf32> to vector<2x1xf32>
      %c0_21 = arith.constant 0 : index
      %c0_22 = arith.constant 0 : index
      %23 = vector.load %arg6[%c0_21, %c0_22] : memref<1x1xf32, #tpu.memory_space<vmem>>, vector<1x1xf32>
      %24 = vector.broadcast %23 : vector<1x1xf32> to vector<2x1xf32>
      %25 = arith.addf %22, %24 : vector<2x1xf32>
      %cst_23 = arith.constant 0.000000e+00 : f32
      %26 = vector.broadcast %cst_23 : f32 to vector<2x1xf32>
      %27 = arith.maximumf %25, %26 : vector<2x1xf32>
      %c0_24 = arith.constant 0 : index
      %c0_25 = arith.constant 0 : index
      %28 = vector.load %arg7[%c0_24, %c0_25] : memref<2x1xf32, #tpu.memory_space<vmem>>, vector<2x1xf32>
      tpu.vector_store %arg7[%c0_24, %c0_25], %27 {strides = array<i32>} : memref<2x1xf32, #tpu.memory_space<vmem>>, vector<2x1xf32>,
    } else {
    }
    return
  }
  func.func @transform_0(%arg0: i32, %arg1: i32) -> (i32, i32, i32) {
    %c0_i32 = arith.constant 0 : i32
    %c0_i32_0 = arith.constant 0 : i32
    return %arg0, %c0_i32, %arg1 : i32, i32, i32
  }
  func.func @transform_1(%arg0: i32, %arg1: i32) -> (i32, i32) {
    %c0_i32 = arith.constant 0 : i32
    %c0_i32_0 = arith.constant 0 : i32
    %c0_i32_1 = arith.constant 0 : i32
    return %c0_i32, %c0_i32_0 : i32, i32
  }
  func.func @transform_2(%arg0: i32, %arg1: i32) -> (i32, i32) {
    %c0_i32 = arith.constant 0 : i32
    %c0_i32_0 = arith.constant 0 : i32
    %c0_i32_1 = arith.constant 0 : i32
    return %c0_i32, %c0_i32_0 : i32, i32
  }
  func.func @transform_3(%arg0: i32, %arg1: i32) -> (i32, i32) {
    %c0_i32 = arith.constant 0 : i32
    %c0_i32_0 = arith.constant 0 : i32
    %c0_i32_1 = arith.constant 0 : i32
    return %c0_i32, %c0_i32_0 : i32, i32
  }
  func.func @transform_4(%arg0: i32, %arg1: i32) -> (i32, i32) {
    %c0_i32 = arith.constant 0 : i32
    %c0_i32_0 = arith.constant 0 : i32
    %c0_i32_1 = arith.constant 0 : i32
    return %c0_i32, %c0_i32_0 : i32, i32
  }
  func.func @transform_5(%arg0: i32, %arg1: i32) -> (i32, i32) {
    %c0_i32 = arith.constant 0 : i32
    %c0_i32_0 = arith.constant 0 : i32
    return %arg0, %c0_i32 : i32, i32
  }
}

</mosaic_0001>

<bundles_post_ra>
// kernel: tpu_custom_call.1
= control target key start
LH: loop header
LB: loop body
LE: loop exit
PB: predicated region body
PF: predicated region fallthrough
CT: control target
= control target key end

     0   :  { %s1047_s0 = inlined_call_operand.hbm [shape: f32[2,32,256], index: 0, kind: input, shape index: {}]   ;;  %s1048_s1 = inlined_call_operand.hbm [shape: f32[32,32], index: 1, kind: input, shape index: {}]   ;;  %s1049_s2 = inlined_call_operand.vmem [shape: f32[1,32], index: 2, kind: input, shape index: {}]   ;;  %s1050_s3 = inlined_call_operand.vmem [shape: f32[1,32], index: 3, kind: input, shape index: {}]   ;;  %s1051_s4 = inlined_call_operand.<no memory space> [shape: f32[1,1], index: 4, kind: input, shape index: {}]   ;;  %s1052_s5 = inlined_call_operand.vmem [shape: f32[2,1], index: 5, kind: output, shape index: {}]  }
   0x1   :  { %v10_v0 = vstv %s1051_s4 }
   0x2   :  { %11 = vst [vmem:[#allocation3] sm:$0x1] %v10_v0 }
   0x3   :  { %12 = vsyncpa [#allocation5], 0 }
   0x4   :  { %14 = vsyncpa [#allocation5 + $0x1], 0 }
   0x5   :  { %15 = vsyncpa [#allocation7], 0  ;;  %s866_s20 = smov 0   ;;  %s868_s21 = smov 0  }
   0x6   :  { %s870_s22 = smov 0   ;;  %s872_s23 = smov 0  }
   0x7   :  { %s874_s24 = smov 0   ;;  %s876_s25 = smov 0  }
   0x8 LB: > { %s595_s4 = sadd.s32 4294967295, %s822_s25   ;;  %p49_p0 = scmp.ne.s32.totalorder %s810_s22, %s806_s21  ;;  %s822_s25 = sphi %s876_s25, %s21_s25   ;;  %s818_s24 = sphi %s874_s24, %s1071_s24   ;;  %s814_s23 = sphi %s872_s23, %s1070_s23   ;;  %s810_s22 = sphi %s870_s22, %s1069_s22   ;;  %s806_s21 = sphi %s868_s21, %s1068_s21   ;;  %s802_s20 = sphi %s866_s20, %s1067_s20  }
   0x9   : > { %p50_p1 = scmp.eq.s32.totalorder %s822_s25, 0  ;;  %p55_p2 = scmp.ne.s32.totalorder %s806_s21, %s802_s20 }
   0xa   : > { %p899_p3 = scmp.eq.s32.totalorder %s595_s4, 0  ;;  %p596_p4 = scmp.ge.s32.totalorder %s822_s25, 1 }
   0xb   : > { %p51_p5 = por %p50_p1, %p49_p0  ;;  %p176_p6 = scmp.lt.s32.totalorder %s822_s25, 3 }
   0xc   : > { %s1058_s26 = scalar_select %p899_p3, 1, 0 }
   0xd   : > { %p907_p7 = por %p899_p3, %p55_p2  ;;  %p911_p8 = pnand %p596_p4, %p176_p6 }
   0xe   : > { %s824_s29 = smov [#allocation6]   ;;  %p650_p11 = scmp.lt.s32.totalorder %s822_s25, 2 }
   0xf   : > { %s1059_s27 = scalar_select %p907_p7, 1, 0 }
  0x10   : > { %s1060_s28 = scalar_select %p911_p8, 1, 0 }
  0x11   : > { %s188_s30 = sshll.u32 %s824_s29, 4  ;;  %p641_p9 = pneg %p911_p8  ;;  %s189_s30 = int_to_ptr.vmem [resolvable:$true] %s188_s30 }
  0x12   : > { %s42_s7 = sadd.s32 1, %s810_s22  ;;  %p925_p12 = pnand %p650_p11, %p51_p5 }
  0x13   : > { %p919_p10 = pnand %p641_p9, %p899_p3  ;;  %s710_s11 = scalar_lea.hbm %s1048_s1, 512 }
  0x14   : > { %s1062_s8 = scalar_select %p925_p12, 1, 0 }
  0x15   : > { %p711_p13 = scmp.ne.s32.totalorder %s1048_s1, %s710_s11  ;;  %p712_p0 = pneg %p919_p10 }
  0x16   : > { %p717_p4 = scmp.lt.u32.totalorder %s710_s11, %s1048_s1 }
  0x17   : > { %p713_p1 = pnand %p712_p0, %p711_p13 }
  0x19   : > { %p714_p2 = pneg %p713_p1 }
  0x1b   : > { %p719_p5 = pnand %p717_p4, %p714_p2 }
  0x1d   : > { %722 = shalt.err (!%p719_p5)
}
  0x1e   : > { %s723_s16 = scalar_lea.vmem %s189_s30, 512  ;;  %p731_p3 = scmp.lt.s32.totalorder %s189_s30, %s189_s30 }
  0x1f   : > { %p724_p6 = scmp.ne.s32.totalorder %s189_s30, %s723_s16  ;;  %p732_p7 = scmp.lt.s32.totalorder %s723_s16, %s723_s16 }
  0x21   : > { %p726_p9 = pnand %p724_p6, %p712_p0  ;;  %p733_p8 = por %p732_p7, %p731_p3 }
  0x23   : > { %p727_p11 = pneg %p726_p9 }
  0x25   : > { %p734_p12 = pnand %p733_p8, %p727_p11 }
  0x27   : > { %737 = shalt.err (!%p734_p12)
}
  0x28   : > { %s825_s17 = smov 128   ;;  %s826_s18 = smov 8  }
  0x29   : > { %644 = dma.hbm_to_vmem [thread:$0]  (!%p919_p10), %s1048_s1, 512, %s189_s30, [#allocation7], %s825_s17, %s825_s17, %s826_s18  }
  0x2a   : > { %s30_s4 = sadd.s32 1, %s818_s24  ;;  %s211_s29 = sand.u32 1, %s810_s22  }
  0x2b   : > { %p31_p3 = scmp.ge.s32.totalorder %s30_s4, 2  ;;  %s599_s9 = sshll.u32 %s211_s29, 6 }
  0x2c   : > { %s600_s10 = sshll.u32 %s818_s24, 7  ;;  %s215_s30 = scalar_lea.vmem [#allocation4], %s599_s9 }
  0x2d   : > { %s1073_s4 = smov (%p31_p3, %s30_s4), 0  ;;  %s956_s6 = scalar_lea.hbm %s1047_s0, %s600_s10 }
  0x2e   : > { %s38_s13 = ssub.s32 %s818_s24, %s1073_s4  ;;  %s224_s14 = sshll.u32 %s215_s30, 4  ;;  %s960_s14 = int_to_ptr.vmem [resolvable:$true] %s224_s14 }
  0x2f   : > { %p40_p7 = scmp.eq.s32.totalorder %s38_s13, 0  ;;  %s967_s16 = scalar_lea.sflag [#allocation5], %s211_s29 }
  0x30   : > { %s738_s19 = scalar_lea.hbm %s956_s6, 1024  ;;  %p1063_p10 = scmp.ne.s32.totalorder %s1062_s8, 0 }
  0x31   : > { %s965_s15 = scalar_select %p40_p7, %s810_s22, %s42_s7  }
  0x32   : > { %p739_p8 = scmp.ne.s32.totalorder %s956_s6, %s738_s19  ;;  %p740_p12 = pneg %p1063_p10 }
  0x33   : > { %s743_s9 = scalar_lea.hbm %s1047_s0, 2048  ;;  %p744_p1 = scmp.lt.u32.totalorder %s956_s6, %s1047_s0 }
  0x34   : > { %p741_p13 = pnand %p740_p12, %p739_p8  ;;  %p745_p2 = scmp.lt.u32.totalorder %s743_s9, %s738_s19 }
  0x35   : > { %p747_p5 = scmp.lt.u32.totalorder %s738_s19, %s956_s6 }
  0x36   : > { %p742_p0 = pneg %p741_p13  ;;  %p746_p4 = por %p745_p2, %p744_p1 }
  0x38   : > { %p748_p6 = por %p747_p5, %p746_p4 }
  0x3a   : > { %p749_p9 = pnand %p748_p6, %p742_p0 }
  0x3c   : > { %752 = shalt.err (!%p749_p9)
}
  0x3d   : > { %s753_s7 = scalar_lea.vmem %s960_s14, 1024  ;;  %s827_s29 = smov [#allocation4]  }
  0x3e   : > { %p754_p11 = scmp.ne.s32.totalorder %s960_s14, %s753_s7  ;;  %s758_s13 = sshll.u32 %s827_s29, 4  ;;  %s759_s13 = int_to_ptr.vmem [resolvable:$false] %s758_s13 }
  0x3f   : > { %s760_s30 = scalar_lea.vmem %s759_s13, 2048  ;;  %p761_p8 = scmp.lt.s32.totalorder %s960_s14, %s759_s13 }
  0x40   : > { %p756_p3 = pnand %p754_p11, %p740_p12  ;;  %p762_p13 = scmp.lt.s32.totalorder %s760_s30, %s753_s7 }
  0x42   : > { %p757_p7 = pneg %p756_p3  ;;  %p763_p1 = por %p762_p13, %p761_p8 }
  0x44   : > { %p764_p2 = pnand %p763_p1, %p757_p7 }
  0x46   : > { %767 = shalt.err (!%p764_p2)
}
  0x47   : > { %s828_s19 = smov 256   ;;  %p1064_p12 = scmp.ne.s32.totalorder %s1060_s28, 0 }
  0x48   : > { %648 = dma.hbm_to_vmem [thread:$0]  (!%p1063_p10), %s956_s6, 1024, %s960_s14, %s967_s16, %s828_s19, %s825_s17, %s826_s18  }
  0x49   : > { %236 = sbr.rel (%p1064_p12) target bundleno = 640 (0x280), region = 40  ;;  %s238_s20 = sand.u32 (!%p1064_p12), 1, %s806_s21  }
  0x4a   : > { %s602_s10 = sshll.u32 (!%p1064_p12), %s238_s20, 6  ;;  %s239_s9 = scalar_lea.sflag (!%p1064_p12), [#allocation5], %s238_s20 }
  0x4b   : > { %s1000_s11 = scalar_lea.vmem (!%p1064_p12), [#allocation4], %s602_s10  ;;  %p1065_p0 = scmp.ne.s32.totalorder (!%p1064_p12), %s1059_s27, 0 }
  0x50   : > { %793 = dma.done.wait (%p1065_p0), %s239_s9, 1024  }
  0x51   : > { %795 = vsyncadd (%p1065_p0), %s239_s9, 4294966272  ;;  %p1066_p4 = scmp.ne.s32.totalorder %s1058_s26, 0 }
  0x53   : > { %797 = dma.done.wait (%p1066_p4), [#allocation7], 512  }
  0x54   : > { %799 = vsyncadd (%p1066_p4), [#allocation7], 4294966784  ;;  %p604_p10 = scmp.ne.s32.totalorder %s814_s23, 0 }
  0x55   : > { %v829_v1 = vmov (!%p604_p10), 0.0  }
  0x56   : > { %280 = sbr.rel (%p604_p10) target bundleno = 93 (0x5d), region = 52  ;;  %281 = vst [vmem:[#allocation2] sm:$0xff] (!%p604_p10), %v829_v1  ;;  %282 = vst [vmem:[#allocation2 + $0x8] sm:$0xff] (!%p604_p10), %v829_v1 }
  0x57   : > { %283 = vst [vmem:[#allocation2 + $0x10] sm:$0xff] (!%p604_p10), %v829_v1  ;;  %284 = vst [vmem:[#allocation2 + $0x18] sm:$0xff] (!%p604_p10), %v829_v1 }
  0x58   : > { %285 = vst [vmem:[#allocation2 + $0x20] sm:$0xff] (!%p604_p10), %v829_v1  ;;  %286 = vst [vmem:[#allocation2 + $0x28] sm:$0xff] (!%p604_p10), %v829_v1 }
  0x59   : > { %287 = vst [vmem:[#allocation2 + $0x30] sm:$0xff] (!%p604_p10), %v829_v1  ;;  %288 = vst [vmem:[#allocation2 + $0x38] sm:$0xff] (!%p604_p10), %v829_v1 }
  0x5d PF: > { %v289_v2 = vld [vmem:[%s1000_s11] sm:$0xff]  ;;  %v290_v4 = vld [vmem:[%s1000_s11 + $0x8] sm:$0xff]  ;;  %v291_v7 = vld [vmem:[%s1000_s11 + $0x10] sm:$0xff]  ;;  %p605_p5 = scmp.ne.s32.totalorder %s814_s23, 1 }
  0x5e   : > { %v297_v3 = vld [vmem:[#allocation2] sm:$0xff]  ;;  %v298_v6 = vld [vmem:[#allocation2 + $0x8] sm:$0xff]  ;;  %v299_v8 = vld [vmem:[#allocation2 + $0x10] sm:$0xff]  ;;  %v830_v37 = vmov (!%p605_p5), 0.0|0.0   ;;  %vm831_vm0 = vmmov (!%p605_p5), 0   ;;  %v832_v41 = vmov (!%p605_p5), 0.0   ;;  %v368_v42 = vlaneseq (!%p605_p5) }
  0x5f   : > { %v305_v5 = vadd.f32 %v297_v3, %v289_v2  ;;  %v306_v9 = vadd.f32 %v298_v6, %v290_v4  ;;  %v307_v10 = vadd.f32 %v299_v8, %v291_v7  ;;  %v292_v11 = vld [vmem:[%s1000_s11 + $0x18] sm:$0xff]  ;;  %v293_v13 = vld [vmem:[%s1000_s11 + $0x20] sm:$0xff]  ;;  %v294_v16 = vld [vmem:[%s1000_s11 + $0x28] sm:$0xff]  ;;  %324 = sbr.rel (%p605_p5) target bundleno = 640 (0x280), region = 56  ;;  %629 = vmatprep.subr.bf16.mxu0 (!%p605_p5), %v830_v37  ;;  %626 = vmatprep.mubr.msk.f32.mxu0 (!%p605_p5), %vm831_vm0, %v832_v41  ;;  %vm379_vm1 = vcmask (!%p605_p5), 130112  }
  0x60   : > { %v300_v12 = vld [vmem:[#allocation2 + $0x18] sm:$0xff]  ;;  %v301_v15 = vld [vmem:[#allocation2 + $0x20] sm:$0xff]  ;;  %v302_v17 = vld [vmem:[#allocation2 + $0x28] sm:$0xff]  ;;  %v369_v43 = vand.u32 (!%p605_p5), 127, %v368_v42  ;;  %v371_v48 = vshrl.u32 (!%p605_p5), %v368_v42, 7  ;;  %vm386_vm2 = vcmask (!%p605_p5), 195712  }
  0x61   : > { %313 = vst [vmem:[#allocation2] sm:$0xff] %v305_v5  ;;  %v308_v14 = vadd.f32 %v300_v12, %v292_v11  ;;  %314 = vst [vmem:[#allocation2 + $0x8] sm:$0xff] %v306_v9  ;;  %v309_v18 = vadd.f32 %v301_v15, %v293_v13  ;;  %v310_v19 = vadd.f32 %v302_v17, %v294_v16  ;;  %v295_v20 = vld [vmem:[%s1000_s11 + $0x30] sm:$0xff]  ;;  %v296_v22 = vld [vmem:[%s1000_s11 + $0x38] sm:$0xff]  ;;  %vm393_vm3 = vcmask (!%p605_p5), 261312  }
  0x62   : > { %315 = vst [vmem:[#allocation2 + $0x10] sm:$0xff] %v307_v10  ;;  %v303_v21 = vld [vmem:[#allocation2 + $0x30] sm:$0xff]  ;;  %v304_v24 = vld [vmem:[#allocation2 + $0x38] sm:$0xff]  ;;  %v349_v34 = vld [vmem:[#allocation6] sm:$0xff] (!%p605_p5)  ;;  %v374_v46 = vadd.s32 (!%p605_p5), 4294967288, %v369_v43  ;;  %v381_v47 = vadd.s32 (!%p605_p5), 4294967280, %v369_v43  ;;  %v372_v54 = vsub.s32 (!%p605_p5), %v369_v43, %v371_v48 }
  0x63   : > { %316 = vst [vmem:[#allocation2 + $0x18] sm:$0xff] %v308_v14  ;;  %v311_v23 = vadd.f32 %v303_v21, %v295_v20  ;;  %317 = vst [vmem:[#allocation2 + $0x20] sm:$0xff] %v309_v18  ;;  %v312_v25 = vadd.f32 %v304_v24, %v296_v22  ;;  %v350_v35 = vld [vmem:[#allocation6 + $0x8] sm:$0xff] (!%p605_p5)  ;;  %v351_v38 = vld [vmem:[#allocation6 + $0x10] sm:$0xff] (!%p605_p5)  ;;  %v388_v52 = vadd.s32 (!%p605_p5), 4294967272, %v369_v43  ;;  %vm414_vm4 = vcmask (!%p605_p5), 1041409  }
  0x64   : > { %318 = vst [vmem:[#allocation2 + $0x28] sm:$0xff] %v310_v19  ;;  %v630_v36 = vpack.c.bf16 (!%p605_p5), %v350_v35, %v349_v34  ;;  %v352_v39 = vld [vmem:[#allocation6 + $0x18] sm:$0xff] (!%p605_p5)  ;;  %v377_v51 = vsub.s32 (!%p605_p5), %v374_v46, %v371_v48  ;;  %v384_v53 = vsub.s32 (!%p605_p5), %v381_v47, %v371_v48  ;;  %vm416_vm5 = vcmask (!%p605_p5), 261120  }
  0x65   : > { %319 = vst [vmem:[#allocation2 + $0x30] sm:$0xff] %v311_v23  ;;  %320 = vst [vmem:[#allocation2 + $0x38] sm:$0xff] %v312_v25  ;;  %v633_v40 = vpack.c.bf16 (!%p605_p5), %v352_v39, %v351_v38  ;;  %v391_v59 = vsub.s32 (!%p605_p5), %v388_v52, %v371_v48  ;;  %v606_v11 = vld [vmem:[%s1049_s2] ss:$0 sm:$0xff] (!%p605_p5)  ;;  %vm498_vm6 = vcmask (!%p605_p5), 254976   ;;  %vm511_vm7 = vcmask (!%p605_p5), 1024  }
  0x66   : > { %631 = vmatpush3.bf16.msra.mxu0 %v630_v36  ;;  %v608_v15 = vld [vmem:[%s1050_s3] ss:$0 sm:$0xff] }
  0x67   : > { %632 = vmatprep.subr.bf16.mxu0 %v830_v37  ;;  %v609_v19 = vld [vmem:[#allocation3] ss:$0 sm:$0xff] }
  0x68   : > { %v325_v27 = vld [vmem:[#allocation2] sm:$0xff]  ;;  %v326_v29 = vld [vmem:[#allocation2 + $0x8] sm:$0xff] }
  0x69   : > { %333 = vadd.xlane.f32.xlu0 %v325_v27  ;;  %v327_v31 = vld [vmem:[#allocation2 + $0x10] sm:$0xff] }
  0x6a   : > { %v329_v26 = vld [vmem:[#allocation2 + $0x20] sm:$0xff]  ;;  %v328_v33 = vld [vmem:[#allocation2 + $0x18] sm:$0xff]  ;;  %634 = vmatpush3.bf16.msra.mxu0 %v633_v40 }
  0x6b   : > { %341 = vadd.xlane.f32.xlu1 %v329_v26  ;;  %v330_v28 = vld [vmem:[#allocation2 + $0x28] sm:$0xff] }
  0x6c   : > { %v331_v30 = vld [vmem:[#allocation2 + $0x30] sm:$0xff]  ;;  %v332_v32 = vld [vmem:[#allocation2 + $0x38] sm:$0xff] }
  0x6d   : > { %335 = vadd.xlane.f32.xlu0 %v326_v29 }
  0x6f   : > { %343 = vadd.xlane.f32.xlu1 %v330_v28 }
  0x71   : > { %337 = vadd.xlane.f32.xlu0 %v327_v31 }
  0x73   : > { %345 = vadd.xlane.f32.xlu1 %v331_v30 }
  0x75   : > { %339 = vadd.xlane.f32.xlu0 %v328_v33 }
  0x77   : > { %347 = vadd.xlane.f32.xlu1 %v332_v32 }
  0xf6   : > { %v334_v45 = vpop.xlane.xlu0 %333 }
  0xf7   : > { %v373_v63 = vrot.slane %v334_v45, %v372_v54 }
  0xf8   : > { %v342_v44 = vpop.xlane.xlu1 %341 }
  0xf9   : > { %v398_v62 = vrot.slane %v342_v44, %v372_v54 }
  0xfa   : > { %v336_v50 = vpop.xlane.xlu0 %335 }
  0xfb   : > { %v378_v58 = vrot.slane %v336_v50, %v377_v51 }
  0xfc   : > { %v344_v49 = vpop.xlane.xlu1 %343 }
  0xfd   : > { %v402_v57 = vrot.slane %v344_v49, %v377_v51  ;;  %v380_v3 = vsel %vm379_vm1, %v378_v58, %v373_v63 }
  0xfe   : > { %v338_v56 = vpop.xlane.xlu0 %337 }
  0xff   : > { %v385_v61 = vrot.slane %v338_v56, %v384_v53  ;;  %v403_v2 = vsel %vm379_vm1, %v402_v57, %v398_v62 }
 0x100   : > { %v346_v55 = vpop.xlane.xlu1 %345 }
 0x101   : > { %v407_v60 = vrot.slane %v346_v55, %v384_v53  ;;  %v387_v7 = vsel %vm386_vm2, %v385_v61, %v380_v3 }
 0x102   : > { %v340_v1 = vpop.xlane.xlu0 %339 }
 0x103   : > { %v392_v5 = vrot.slane %v340_v1, %v391_v59  ;;  %v408_v6 = vsel %vm386_vm2, %v407_v60, %v403_v2 }
 0x104   : > { %v348_v0 = vpop.xlane.xlu1 %347 }
 0x105   : > { %v412_v4 = vrot.slane %v348_v0, %v391_v59  ;;  %v394_v9 = vsel %vm393_vm3, %v392_v5, %v387_v7 }
 0x107   : > { %v413_v8 = vsel %vm393_vm3, %v412_v4, %v408_v6 }
 0x108   : > { %v415_v10 = vsel %vm414_vm4, %v413_v8, %v394_v9 }
 0x109   : > { %627 = vmatmul.mubr.msk.f32.vlgmr.msra.gmra.mrb[0].mxu0 %vm416_vm5, %v415_v10 }
 0x1dc   : > { %v485_v12 = vpop.f32.mrb[0].mxu0 }
 0x1dd   : > { %v486_v13 = vadd.f32 %v606_v11, %v485_v12  ;;  %v628_v14 = vpop.f32.mrb[1].mxu0 }
 0x1df   : > { %708 = vtanh.f32 %v486_v13 }
 0x1e9   : > { %v709_v16 = vpop.eup %708 }
 0x1ea   : > { %v497_v17 = vmul.f32 %v709_v16, %v608_v15 }
 0x1ec   : > { %v499_v18 = vsel %vm498_vm6, %v497_v17, 0.0 }
 0x1ed   : > { %500 = vadd.xlane.f32.xlu0 %v499_v18 }
 0x27a   : > { %v501_v20 = vpop.xlane.xlu0 %500 }
 0x27b   : > { %v509_v21 = vadd.f32 %v609_v19, %v501_v20 }
 0x27d   : > { %v510_v22 = vmax.f32 %v509_v21, 0.0 }
 0x27f   : > { %512 = vst.msk [vmem:[%s1052_s5] sm:$0x3] %vm511_vm7, %v510_v22 }
 0x280 PF: > { %s21_s25 = sadd.s32 1, %s822_s25   ;;  %s1067_s20 = smov %s806_s21 }
 0x281   : > { %p18_p6 = scmp.ge.s32.totalorder %s21_s25, 4   ;;  %s1068_s21 = smov %s810_s22 }
 0x282   : > { %s1069_s22 = smov %s965_s15  ;;  %s1070_s23 = smov %s818_s24 }
 0x283   : > { %s1071_s24 = smov %s1073_s4  ;;  %20 = sbr.rel (!%p18_p6) target bundleno = 8 (0x8), region = 92 }
 0x28a   :  { %532 = vsyncpa [#allocation5], 1 }
 0x28b   :  { %534 = vsyncpa [#allocation5 + $0x1], 1 }
 0x28c   :  { %535 = vsyncpa [#allocation7], 1 }

</bundles_post_ra>
